<compile_context>
chip_gen: v6e
topology: v6e:2x2x1
jax: 0.10.0
libtpu: 0.0.40
codegen_flags: <defaults>
</compile_context>

<pallas_src>
from typing import NamedTuple

import jax
import jax.numpy as jnp
from jax.experimental import pallas as pl
from jax.experimental.pallas import tpu as pltpu


LANE = 128        # TPU lane width (last-dim alignment target)
SUBLANE = 8       # TPU sublane width (second-to-last-dim alignment target)
_MIB = 1024 * 1024


def _round_up(n, m):
    return ((n + m - 1) // m) * m


def _pad2d(a, rows, cols):
    return jnp.pad(a, ((0, rows - a.shape[0]), (0, cols - a.shape[1])))


def _vmem_capacity_bytes():
    """Physical VMEM for this generation (64 MiB/core on v7x, 128 MiB else)."""
    try:
        return int(pltpu.get_tpu_info().vmem_capacity_bytes)
    except Exception:
        return 64 * _MIB  # conservative default (v7x per-TensorCore)


class PreparedParams(NamedTuple):
    w1: jax.Array   # [d_in, hid_p]
    b1: jax.Array   # [1, hid_p]        (always f32)
    w2: jax.Array   # [hid_p, hid_p]
    b2: jax.Array   # [1, hid_p]
    w3: jax.Array   # [hid_p, num_classes]
    b3: jax.Array   # [1, num_classes]


def prepare_params(w1, b1, w2, b2, w3, b3, *, use_bf16=False):
    """One-time weight prep: pad the hidden dim, optionally cast to bf16.

    Weights are static across calls, so padding/casting here (instead of per
    forward) removes 3+ HBM copy ops per call.
    """
    d_in, hidden = w1.shape
    num_classes = w3.shape[1]

    # v6e/v7x MXUs are 2x256^2: bf16 only pays off with 256-wide N tiles;
    # v5e's 4x128^2 is saturated at 128 (keep f32 there anyway).
    lane_mult = 256 if use_bf16 else LANE
    hid_p = _round_up(hidden, lane_mult)

    b1 = jnp.asarray(b1).reshape(1, -1)
    b2 = jnp.asarray(b2).reshape(1, -1)
    b3 = jnp.asarray(b3).reshape(1, -1)

    w1p = _pad2d(w1, d_in, hid_p)
    b1p = _pad2d(b1, 1, hid_p)
    w2p = _pad2d(w2, hid_p, hid_p)
    b2p = _pad2d(b2, 1, hid_p)
    w3p = _pad2d(w3, hid_p, num_classes)
    b3p = _pad2d(b3, 1, num_classes)

    if use_bf16:
        # Matmul operands in bf16 (v6e/v7x MXU-native); biases stay f32 so the
        # bias-add / ReLU epilogue runs on the f32 VPU datapath.
        w1p = w1p.astype(jnp.bfloat16)
        w2p = w2p.astype(jnp.bfloat16)
        w3p = w3p.astype(jnp.bfloat16)
    # TODO(synk): on v7x, fp8 (not int8) weights would be the quantized MXU path.

    return PreparedParams(w1p, b1p, w2p, b2p, w3p, b3p)


def mlp_kernel(x_ref, w1_ref, b1_ref, w2_ref, b2_ref, w3_ref, b3_ref, o_ref):
    """One batch tile of the fused MLP. f32 accumulation, f32 bias/ReLU."""
    x = x_ref[...].astype(w1_ref.dtype)  # no-op in the default f32 path
    h = jnp.dot(x, w1_ref[...], preferred_element_type=jnp.float32)
    h = jnp.maximum(h + b1_ref[...], 0.0)
    h = jnp.dot(h.astype(w2_ref.dtype), w2_ref[...],
                preferred_element_type=jnp.float32)
    h = jnp.maximum(h + b2_ref[...], 0.0)
    out = jnp.dot(h.astype(w3_ref.dtype), w3_ref[...],
                  preferred_element_type=jnp.float32)
    o_ref[...] = (out + b3_ref[...]).astype(o_ref.dtype)


def _xla_forward(x, p: PreparedParams):
    """Small-batch / doesn't-fit-VMEM fallback: fused XLA dot chain."""
    h = jnp.maximum(x @ p.w1.astype(jnp.float32) + p.b1, 0.0)
    h = jnp.maximum(h @ p.w2.astype(jnp.float32) + p.b2, 0.0)
    return h @ p.w3.astype(jnp.float32) + p.b3


def neuralnet_forward(x, params: PreparedParams, *, batch_tile=1024,
                      small_batch_bypass=True, interpret=False):
    """Fused MLP forward. x: [B, input_size] f32 -> [B, num_classes] f32."""
    B, d_in = x.shape
    p = params
    assert p.w1.shape[0] == d_in, "x feature dim does not match prepared w1"
    hid_p = p.w1.shape[1]
    num_classes = p.w3.shape[1]

    # Small-batch bypass: launch + per-step (~0.35us) overhead dominates until
    # the batch axis amortizes it.
    if small_batch_bypass and B < batch_tile:
        return _xla_forward(x, p)

    # --- batch tiling ------------------------------------------------------
    tm = batch_tile if B >= batch_tile else _round_up(B, SUBLANE)
    # v7x megacore: make sure the "parallel" batch axis has >= 2 grid steps so
    # both TensorCores get work (harmless on v5e/v6e).
    if B >= 2 * 256:
        tm = min(tm, max(_round_up(pl.cdiv(B, 2), SUBLANE), 256))
    grid = (pl.cdiv(B, tm),)  # uneven final block is masked by Pallas

    # --- generation-aware VMEM budget ---------------------------------------
    w_itemsize = p.w1.dtype.itemsize
    weight_bytes = ((p.w1.size + p.w2.size + p.w3.size) * w_itemsize
                    + (p.b1.size + p.b2.size + p.b3.size) * 4)
    io_bytes = 2 * tm * (d_in + num_classes) * 4      # double-buffered x/out tiles
    scratch_bytes = 2 * tm * hid_p * 4                # f32 h intermediates
    cap = int(0.75 * _vmem_capacity_bytes())          # ~48 MiB v7x, ~96 MiB v5e/v6e

    def _needed(weight_bufs):
        return weight_bufs * weight_bytes + io_bytes + scratch_bytes

    if _needed(1) > cap:
        # Resident weights don't fit this generation's VMEM.
        # TODO(synk): add a hidden/K-tiled reduction-grid path (accumulator
        # scratch + pl.when init/finalize, axis "arbitrary") instead of XLA.
        return _xla_forward(x, p)

    # Advisory cost estimate so XLA schedules neighbors around the call.
    flops = 2 * B * (d_in * hid_p + hid_p * hid_p + hid_p * num_classes)
    bytes_accessed = int(x.size * x.dtype.itemsize + weight_bytes
                         + B * num_classes * 4)
    cost = pl.CostEstimate(flops=flops, transcendentals=0,
                           bytes_accessed=bytes_accessed)

    def _run(single_buffer_weights):
        if single_buffer_weights:
            weight_bufs = 1

            def wspec(shape):
                # Constant index_map + single buffering: weights stay VMEM
                # resident across batch tiles at 1x (not 2x) their size.
                return pl.BlockSpec(shape, lambda i: (0, 0),
                                    pipeline_mode=pl.Buffered(1))
        else:
            weight_bufs = 2

            def wspec(shape):
                return pl.BlockSpec(shape, lambda i: (0, 0))

        vmem_limit = min(max(int(_needed(weight_bufs) * 1.25), 16 * _MIB), cap)

        return pl.pallas_call(
            mlp_kernel,
            out_shape=jax.ShapeDtypeStruct((B, num_classes), jnp.float32),
            grid=grid,
            in_specs=[
                # x: tiled along batch only; last dim equals the full array
                # extent (no wrapper lane padding, no extra HBM traffic).
                pl.BlockSpec((tm, d_in), lambda i: (i, 0)),
                wspec((d_in, hid_p)),
                wspec((1, hid_p)),
                wspec((hid_p, hid_p)),
                wspec((1, hid_p)),
                wspec((hid_p, num_classes)),
                wspec((1, num_classes)),
            ],
            # Output: last dim equals the full array extent (num_classes); no
            # pad-to-128 + slice round trip.
            out_specs=pl.BlockSpec((tm, num_classes), lambda i: (i, 0)),
            compiler_params=pltpu.CompilerParams(
                dimension_semantics=("parallel",),   # batch tiles independent
                vmem_limit_bytes=vmem_limit,
            ),
            cost_estimate=cost,
            interpret=interpret,
        )(x, p.w1, p.b1, p.w2, p.b2, p.w3, p.b3)

    try:
        return _run(single_buffer_weights=True)
    except Exception:
        # jax build without Buffered(1) support on BlockSpec: fall back to the
        # default double-buffered resident weights (identical math).
        return _run(single_buffer_weights=False)


def init_params(key, input_size, hidden_size, num_classes):
    """Deterministic init mimicking nn.Linear (uniform in +/- 1/sqrt(fan_in))."""
    ks = jax.random.split(key, 6)

    def linear(kw, kb, fan_in, fan_out):
        bound = 1.0 / jnp.sqrt(fan_in)
        # Stored transposed vs. PyTorch ([in, out] instead of [out, in]).
        w = jax.random.uniform(kw, (fan_in, fan_out), jnp.float32, -bound, bound)
        b = jax.random.uniform(kb, (1, fan_out), jnp.float32, -bound, bound)
        return w, b

    w1, b1 = linear(ks[0], ks[1], input_size, hidden_size)
    w2, b2 = linear(ks[2], ks[3], hidden_size, hidden_size)
    w3, b3 = linear(ks[4], ks[5], hidden_size, num_classes)
    return w1, b1, w2, b2, w3, b3


if __name__ == "__main__":
    # Small shapes consistent with the module: batch=8, input=32, hidden=32,
    # num_classes=10.
    batch, input_size, hidden_size, num_classes = 8, 32, 32, 10

    key = jax.random.PRNGKey(0)
    kx, kp = jax.random.split(key)
    x = jax.random.normal(kx, (batch, input_size), jnp.float32)
    w1, b1, w2, b2, w3, b3 = init_params(kp, input_size, hidden_size, num_classes)

    # One-time weight prep (padding / optional bf16 cast hoisted out of forward).
    params = prepare_params(w1, b1, w2, b2, w3, b3, use_bf16=False)

    # Exercise the Pallas kernel path explicitly (the small-batch bypass would
    # otherwise pick the XLA path at this tiny batch).
    out = neuralnet_forward(x, params, small_batch_bypass=False)
    out = jax.block_until_ready(out)

    # Pure-JAX reference check against the original (unpadded) weights.
    h = jnp.maximum(x @ w1 + b1, 0.0)
    h = jnp.maximum(h @ w2 + b2, 0.0)
    ref = h @ w3 + b3

    assert out.shape == (batch, num_classes)
    assert jnp.allclose(out, ref, atol=1e-4, rtol=1e-4), \
        float(jnp.max(jnp.abs(out - ref)))

    # Small-batch bypass (default path at B=8) must agree as well.
    out_bypass = jax.block_until_ready(neuralnet_forward(x, params))
    assert jnp.allclose(out_bypass, ref, atol=1e-4, rtol=1e-4)

    print("KERNEL_OK")
</pallas_src>

<mosaic_0001>
module attributes {stable_mosaic.version = 11 : i64} {
  func.func @mlp_kernel(%arg0: i32, %arg1: memref<8x32xf32, #tpu.memory_space<vmem>>, %arg2: memref<32x128xf32, #tpu.memory_space<vmem>>, %arg3: memref<1x128xf32, #tpu.memory_space<vmem>>, %arg4: memref<128x128xf32, #tpu.memory_space<vmem>>, %arg5: memref<1x128xf32, #tpu.memory_space<vmem>>, %arg6: memref<128x10xf32, #tpu.memory_space<vmem>>, %arg7: memref<1x10xf32, #tpu.memory_space<vmem>>, %arg8: memref<8x10xf32, #tpu.memory_space<vmem>>) attributes {dimension_semantics = [#tpu.dimension_semantics<parallel>], iteration_bounds = array<i64: 1>, scalar_prefetch = 0 : i64, scratch_operands = 0 : i64, tpu.core_type = #tpu.core_type<tc>, window_params = [{transform_indices = @transform_0, window_bounds = array<i64: 8, 32>}, {pipeline_mode = #tpu.pipeline_mode<synchronous>, transform_indices = @transform_1, window_bounds = array<i64: 32, 128>}, {pipeline_mode = #tpu.pipeline_mode<synchronous>, transform_indices = @transform_2, window_bounds = array<i64: 1, 128>}, {pipeline_mode = #tpu.pipeline_mode<synchronous>, transform_indices = @transform_3, window_bounds = array<i64: 128, 128>}, {pipeline_mode = #tpu.pipeline_mode<synchronous>, transform_indices = @transform_4, window_bounds = array<i64: 1, 128>}, {pipeline_mode = #tpu.pipeline_mode<synchronous>, transform_indices = @transform_5, window_bounds = array<i64: 128, 10>}, {pipeline_mode = #tpu.pipeline_mode<synchronous>, transform_indices = @transform_6, window_bounds = array<i64: 1, 10>}, {transform_indices = @transform_7, window_bounds = array<i64: 8, 10>}]} {
    %c0 = arith.constant 0 : index
    %c0_0 = arith.constant 0 : index
    %0 = vector.load %arg1[%c0, %c0_0] : memref<8x32xf32, #tpu.memory_space<vmem>>, vector<8x32xf32>
    %c0_1 = arith.constant 0 : index
    %c0_2 = arith.constant 0 : index
    %1 = vector.load %arg2[%c0_1, %c0_2] : memref<32x128xf32, #tpu.memory_space<vmem>>, vector<32x128xf32>
    %cst = arith.constant dense<0.000000e+00> : vector<8x128xf32>
    %2 = tpu.matmul %0, %1, %cst {dimension_numbers = #tpu.dot_dimension_numbers<[1], [0], [0], [1], [0, 0, 1, 1], [], []>} : vector<8x32xf32>, vector<32x128xf32>, vector<8x128xf32> -> vector<8x128xf32>
    %c0_3 = arith.constant 0 : index
    %c0_4 = arith.constant 0 : index
    %3 = vector.load %arg3[%c0_3, %c0_4] : memref<1x128xf32, #tpu.memory_space<vmem>>, vector<1x128xf32>
    %4 = vector.broadcast %3 : vector<1x128xf32> to vector<8x128xf32>
    %5 = arith.addf %2, %4 : vector<8x128xf32>
    %cst_5 = arith.constant 0.000000e+00 : f32
    %6 = vector.broadcast %cst_5 : f32 to vector<8x128xf32>
    %7 = arith.maximumf %5, %6 : vector<8x128xf32>
    %c0_6 = arith.constant 0 : index
    %c0_7 = arith.constant 0 : index
    %8 = vector.load %arg4[%c0_6, %c0_7] : memref<128x128xf32, #tpu.memory_space<vmem>>, vector<128x128xf32>
    %cst_8 = arith.constant dense<0.000000e+00> : vector<8x128xf32>
    %9 = tpu.matmul %7, %8, %cst_8 {dimension_numbers = #tpu.dot_dimension_numbers<[1], [0], [0], [1], [0, 0, 1, 1], [], []>} : vector<8x128xf32>, vector<128x128xf32>, vector<8x128xf32> -> vector<8x128xf32>
    %c0_9 = arith.constant 0 : index
    %c0_10 = arith.constant 0 : index
    %10 = vector.load %arg5[%c0_9, %c0_10] : memref<1x128xf32, #tpu.memory_space<vmem>>, vector<1x128xf32>
    %11 = vector.broadcast %10 : vector<1x128xf32> to vector<8x128xf32>
    %12 = arith.addf %9, %11 : vector<8x128xf32>
    %cst_11 = arith.constant 0.000000e+00 : f32
    %13 = vector.broadcast %cst_11 : f32 to vector<8x128xf32>
    %14 = arith.maximumf %12, %13 : vector<8x128xf32>
    %c0_12 = arith.constant 0 : index
    %c0_13 = arith.constant 0 : index
    %15 = vector.load %arg6[%c0_12, %c0_13] : memref<128x10xf32, #tpu.memory_space<vmem>>, vector<128x10xf32>
    %cst_14 = arith.constant dense<0.000000e+00> : vector<8x10xf32>
    %16 = tpu.matmul %14, %15, %cst_14 {dimension_numbers = #tpu.dot_dimension_numbers<[1], [0], [0], [1], [0, 0, 1, 1], [], []>} : vector<8x128xf32>, vector<128x10xf32>, vector<8x10xf32> -> vector<8x10xf32>
    %c0_15 = arith.constant 0 : index
    %c0_16 = arith.constant 0 : index
    %17 = vector.load %arg7[%c0_15, %c0_16] : memref<1x10xf32, #tpu.memory_space<vmem>>, vector<1x10xf32>
    %18 = vector.broadcast %17 : vector<1x10xf32> to vector<8x10xf32>
    %19 = arith.addf %16, %18 : vector<8x10xf32>
    %c0_17 = arith.constant 0 : index
    %c0_18 = arith.constant 0 : index
    %20 = vector.load %arg8[%c0_17, %c0_18] : memref<8x10xf32, #tpu.memory_space<vmem>>, vector<8x10xf32>
    tpu.vector_store %arg8[%c0_17, %c0_18], %19 {strides = array<i32>} : memref<8x10xf32, #tpu.memory_space<vmem>>, vector<8x10xf32>,
    return
  }
  func.func @transform_0(%arg0: i32) -> (i32, i32) {
    %c0_i32 = arith.constant 0 : i32
    %c0_i32_0 = arith.constant 0 : i32
    return %arg0, %c0_i32 : i32, i32
  }
  func.func @transform_1(%arg0: i32) -> (i32, i32) {
    %c0_i32 = arith.constant 0 : i32
    %c0_i32_0 = arith.constant 0 : i32
    %c0_i32_1 = arith.constant 0 : i32
    return %c0_i32, %c0_i32_0 : i32, i32
  }
  func.func @transform_2(%arg0: i32) -> (i32, i32) {
    %c0_i32 = arith.constant 0 : i32
    %c0_i32_0 = arith.constant 0 : i32
    %c0_i32_1 = arith.constant 0 : i32
    return %c0_i32, %c0_i32_0 : i32, i32
  }
  func.func @transform_3(%arg0: i32) -> (i32, i32) {
    %c0_i32 = arith.constant 0 : i32
    %c0_i32_0 = arith.constant 0 : i32
    %c0_i32_1 = arith.constant 0 : i32
    return %c0_i32, %c0_i32_0 : i32, i32
  }
  func.func @transform_4(%arg0: i32) -> (i32, i32) {
    %c0_i32 = arith.constant 0 : i32
    %c0_i32_0 = arith.constant 0 : i32
    %c0_i32_1 = arith.constant 0 : i32
    return %c0_i32, %c0_i32_0 : i32, i32
  }
  func.func @transform_5(%arg0: i32) -> (i32, i32) {
    %c0_i32 = arith.constant 0 : i32
    %c0_i32_0 = arith.constant 0 : i32
    %c0_i32_1 = arith.constant 0 : i32
    return %c0_i32, %c0_i32_0 : i32, i32
  }
  func.func @transform_6(%arg0: i32) -> (i32, i32) {
    %c0_i32 = arith.constant 0 : i32
    %c0_i32_0 = arith.constant 0 : i32
    %c0_i32_1 = arith.constant 0 : i32
    return %c0_i32, %c0_i32_0 : i32, i32
  }
  func.func @transform_7(%arg0: i32) -> (i32, i32) {
    %c0_i32 = arith.constant 0 : i32
    %c0_i32_0 = arith.constant 0 : i32
    return %arg0, %c0_i32 : i32, i32
  }
}

module attributes {stable_mosaic.version = 11 : i64} {
  func.func @mlp_kernel(%arg0: i32, %arg1: memref<8x32xf32, #tpu.memory_space<vmem>>, %arg2: memref<32x128xf32, #tpu.memory_space<vmem>>, %arg3: memref<1x128xf32, #tpu.memory_space<vmem>>, %arg4: memref<128x128xf32, #tpu.memory_space<vmem>>, %arg5: memref<1x128xf32, #tpu.memory_space<vmem>>, %arg6: memref<128x10xf32, #tpu.memory_space<vmem>>, %arg7: memref<1x10xf32, #tpu.memory_space<vmem>>, %arg8: memref<8x10xf32, #tpu.memory_space<vmem>>) attributes {dimension_semantics = [#tpu.dimension_semantics<parallel>], iteration_bounds = array<i64: 1>, scalar_prefetch = 0 : i64, scratch_operands = 0 : i64, tpu.core_type = #tpu.core_type<tc>, window_params = [{transform_indices = @transform_0, window_bounds = array<i64: 8, 32>}, {pipeline_mode = #tpu.pipeline_mode<synchronous>, transform_indices = @transform_1, window_bounds = array<i64: 32, 128>}, {pipeline_mode = #tpu.pipeline_mode<synchronous>, transform_indices = @transform_2, window_bounds = array<i64: 1, 128>}, {pipeline_mode = #tpu.pipeline_mode<synchronous>, transform_indices = @transform_3, window_bounds = array<i64: 128, 128>}, {pipeline_mode = #tpu.pipeline_mode<synchronous>, transform_indices = @transform_4, window_bounds = array<i64: 1, 128>}, {pipeline_mode = #tpu.pipeline_mode<synchronous>, transform_indices = @transform_5, window_bounds = array<i64: 128, 10>}, {pipeline_mode = #tpu.pipeline_mode<synchronous>, transform_indices = @transform_6, window_bounds = array<i64: 1, 10>}, {transform_indices = @transform_7, window_bounds = array<i64: 8, 10>}]} {
    %c0 = arith.constant 0 : index
    %c0_0 = arith.constant 0 : index
    %0 = vector.load %arg1[%c0, %c0_0] : memref<8x32xf32, #tpu.memory_space<vmem>>, vector<8x32xf32>
    %c0_1 = arith.constant 0 : index
    %c0_2 = arith.constant 0 : index
    %1 = vector.load %arg2[%c0_1, %c0_2] : memref<32x128xf32, #tpu.memory_space<vmem>>, vector<32x128xf32>
    %cst = arith.constant dense<0.000000e+00> : vector<8x128xf32>
    %2 = tpu.matmul %0, %1, %cst {dimension_numbers = #tpu.dot_dimension_numbers<[1], [0], [0], [1], [0, 0, 1, 1], [], []>} : vector<8x32xf32>, vector<32x128xf32>, vector<8x128xf32> -> vector<8x128xf32>
    %c0_3 = arith.constant 0 : index
    %c0_4 = arith.constant 0 : index
    %3 = vector.load %arg3[%c0_3, %c0_4] : memref<1x128xf32, #tpu.memory_space<vmem>>, vector<1x128xf32>
    %4 = vector.broadcast %3 : vector<1x128xf32> to vector<8x128xf32>
    %5 = arith.addf %2, %4 : vector<8x128xf32>
    %cst_5 = arith.constant 0.000000e+00 : f32
    %6 = vector.broadcast %cst_5 : f32 to vector<8x128xf32>
    %7 = arith.maximumf %5, %6 : vector<8x128xf32>
    %c0_6 = arith.constant 0 : index
    %c0_7 = arith.constant 0 : index
    %8 = vector.load %arg4[%c0_6, %c0_7] : memref<128x128xf32, #tpu.memory_space<vmem>>, vector<128x128xf32>
    %cst_8 = arith.constant dense<0.000000e+00> : vector<8x128xf32>
    %9 = tpu.matmul %7, %8, %cst_8 {dimension_numbers = #tpu.dot_dimension_numbers<[1], [0], [0], [1], [0, 0, 1, 1], [], []>} : vector<8x128xf32>, vector<128x128xf32>, vector<8x128xf32> -> vector<8x128xf32>
    %c0_9 = arith.constant 0 : index
    %c0_10 = arith.constant 0 : index
    %10 = vector.load %arg5[%c0_9, %c0_10] : memref<1x128xf32, #tpu.memory_space<vmem>>, vector<1x128xf32>
    %11 = vector.broadcast %10 : vector<1x128xf32> to vector<8x128xf32>
    %12 = arith.addf %9, %11 : vector<8x128xf32>
    %cst_11 = arith.constant 0.000000e+00 : f32
    %13 = vector.broadcast %cst_11 : f32 to vector<8x128xf32>
    %14 = arith.maximumf %12, %13 : vector<8x128xf32>
    %c0_12 = arith.constant 0 : index
    %c0_13 = arith.constant 0 : index
    %15 = vector.load %arg6[%c0_12, %c0_13] : memref<128x10xf32, #tpu.memory_space<vmem>>, vector<128x10xf32>
    %cst_14 = arith.constant dense<0.000000e+00> : vector<8x10xf32>
    %16 = tpu.matmul %14, %15, %cst_14 {dimension_numbers = #tpu.dot_dimension_numbers<[1], [0], [0], [1], [0, 0, 1, 1], [], []>} : vector<8x128xf32>, vector<128x10xf32>, vector<8x10xf32> -> vector<8x10xf32>
    %c0_15 = arith.constant 0 : index
    %c0_16 = arith.constant 0 : index
    %17 = vector.load %arg7[%c0_15, %c0_16] : memref<1x10xf32, #tpu.memory_space<vmem>>, vector<1x10xf32>
    %18 = vector.broadcast %17 : vector<1x10xf32> to vector<8x10xf32>
    %19 = arith.addf %16, %18 : vector<8x10xf32>
    %c0_17 = arith.constant 0 : index
    %c0_18 = arith.constant 0 : index
    %20 = vector.load %arg8[%c0_17, %c0_18] : memref<8x10xf32, #tpu.memory_space<vmem>>, vector<8x10xf32>
    tpu.vector_store %arg8[%c0_17, %c0_18], %19 {strides = array<i32>} : memref<8x10xf32, #tpu.memory_space<vmem>>, vector<8x10xf32>,
    return
  }
  func.func @transform_0(%arg0: i32) -> (i32, i32) {
    %c0_i32 = arith.constant 0 : i32
    %c0_i32_0 = arith.constant 0 : i32
    return %arg0, %c0_i32 : i32, i32
  }
  func.func @transform_1(%arg0: i32) -> (i32, i32) {
    %c0_i32 = arith.constant 0 : i32
    %c0_i32_0 = arith.constant 0 : i32
    %c0_i32_1 = arith.constant 0 : i32
    return %c0_i32, %c0_i32_0 : i32, i32
  }
  func.func @transform_2(%arg0: i32) -> (i32, i32) {
    %c0_i32 = arith.constant 0 : i32
    %c0_i32_0 = arith.constant 0 : i32
    %c0_i32_1 = arith.constant 0 : i32
    return %c0_i32, %c0_i32_0 : i32, i32
  }
  func.func @transform_3(%arg0: i32) -> (i32, i32) {
    %c0_i32 = arith.constant 0 : i32
    %c0_i32_0 = arith.constant 0 : i32
    %c0_i32_1 = arith.constant 0 : i32
    return %c0_i32, %c0_i32_0 : i32, i32
  }
  func.func @transform_4(%arg0: i32) -> (i32, i32) {
    %c0_i32 = arith.constant 0 : i32
    %c0_i32_0 = arith.constant 0 : i32
    %c0_i32_1 = arith.constant 0 : i32
    return %c0_i32, %c0_i32_0 : i32, i32
  }
  func.func @transform_5(%arg0: i32) -> (i32, i32) {
    %c0_i32 = arith.constant 0 : i32
    %c0_i32_0 = arith.constant 0 : i32
    %c0_i32_1 = arith.constant 0 : i32
    return %c0_i32, %c0_i32_0 : i32, i32
  }
  func.func @transform_6(%arg0: i32) -> (i32, i32) {
    %c0_i32 = arith.constant 0 : i32
    %c0_i32_0 = arith.constant 0 : i32
    %c0_i32_1 = arith.constant 0 : i32
    return %c0_i32, %c0_i32_0 : i32, i32
  }
  func.func @transform_7(%arg0: i32) -> (i32, i32) {
    %c0_i32 = arith.constant 0 : i32
    %c0_i32_0 = arith.constant 0 : i32
    return %arg0, %c0_i32 : i32, i32
  }
}

</mosaic_0001>

<bundles_post_ra>
// kernel: tpu_custom_call.1
= control target key start
LH: loop header
LB: loop body
LE: loop exit
PB: predicated region body
PF: predicated region fallthrough
CT: control target
= control target key end

     0   :  { %12 = vsyncpa [#allocation3], 0  ;;  %s708_s0 = inlined_call_operand.vmem [shape: f32[8,32], index: 0, kind: input, shape index: {}]   ;;  %s709_s1 = inlined_call_operand.hbm [shape: f32[32,128], index: 1, kind: input, shape index: {}]   ;;  %s710_s2 = inlined_call_operand.vmem [shape: f32[1,128], index: 2, kind: input, shape index: {}]   ;;  %s711_s3 = inlined_call_operand.vmem [shape: f32[128,128], index: 3, kind: input, shape index: {}]   ;;  %s712_s4 = inlined_call_operand.vmem [shape: f32[1,128], index: 4, kind: input, shape index: {}]   ;;  %s713_s5 = inlined_call_operand.vmem [shape: f32[128,10], index: 5, kind: input, shape index: {}]   ;;  %s714_s6 = inlined_call_operand.vmem [shape: f32[1,10], index: 6, kind: input, shape index: {}]   ;;  %s715_s7 = inlined_call_operand.hbm [shape: f32[8,10], index: 7, kind: output, shape index: {}]  }
   0x1   :  { %13 = vsyncpa [#allocation4], 0  ;;  %s506_s24 = smov [#allocation2]  }
   0x2   :  { %s21_s25 = sshll.u32 %s506_s24, 4  ;;  %s22_s25 = int_to_ptr.vmem [resolvable:$true] %s21_s25 }
   0x3   :  { %s470_s26 = scalar_lea.vmem %s22_s25, 512  ;;  %p475_p1 = scmp.lt.s32.totalorder %s22_s25, %s22_s25 }
   0x4   :  { %p471_p0 = scmp.ne.s32.totalorder %s22_s25, %s470_s26  ;;  %p476_p2 = scmp.lt.s32.totalorder %s470_s26, %s470_s26 }
   0x6   :  { %p477_p3 = por %p476_p2, %p475_p1 }
   0x8   :  { %p478_p4 = pnand %p477_p3, %p471_p0 }
   0xa   :  { %481 = shalt.err (!%p478_p4)
}
   0xb   :  { %s507_s27 = smov 128   ;;  %s508_s28 = smov 8  }
   0xc   :  { %27 = dma.hbm_to_vmem [thread:$0]  %s709_s1, 512, %s22_s25, [#allocation3], %s507_s27, %s507_s27, %s508_s28  }
   0xd   :  { %502 = dma.done.wait [#allocation3], 512  }
   0xe   :  { %503 = vsyncadd [#allocation3], 4294966784  ;;  %v509_v0 = vmov 0.0   ;;  %vm510_vm0 = vmmov 0   ;;  %v45_v1 = vld [vmem:[#allocation2 + $0x18] sm:$0xff]  ;;  %v44_v2 = vld [vmem:[#allocation2 + $0x10] sm:$0xff] }
   0xf   :  { %375 = vmatprep.subr.mxu0 %v509_v0  ;;  %383 = vmatprep.mubr.msk.f32.mxu0 %vm510_vm0, %v509_v0  ;;  %v143_v3 = vld [vmem:[%s711_s3 + $0x78] sm:$0xff]  ;;  %v43_v4 = vld [vmem:[#allocation2 + $0x8] sm:$0xff]  ;;  %v142_v5 = vld [vmem:[%s711_s3 + $0x70] sm:$0xff]  ;;  %vm53_vm1 = vcmask 261120   ;;  %s511_s25 = smov [#allocation5]   ;;  %vm315_vm2 = vcmask 80896  }
  0x10   :  { %386 = vmatprep.subr.mxu1 %v509_v0  ;;  %418 = vmatprep.mubr.msk.f32.mxu1 %vm510_vm0, %v509_v0  ;;  %v141_v6 = vld [vmem:[%s711_s3 + $0x68] sm:$0xff]  ;;  %v42_v7 = vld [vmem:[#allocation2] sm:$0xff]  ;;  %v139_v10 = vld [vmem:[%s711_s3 + $0x58] sm:$0xff]  ;;  %s323_s26 = sshll.u32 %s511_s25, 4  ;;  %s324_s26 = int_to_ptr.vmem [resolvable:$true] %s323_s26 }
  0x11   :  { %376 = vmatpush3.msra.mxu0 %v45_v1  ;;  %387 = vmatpush3.msra.mxu1 %v143_v3  ;;  %v41_v8 = vld [vmem:[%s708_s0] sm:$0xff]  ;;  %v138_v11 = vld [vmem:[%s711_s3 + $0x50] sm:$0xff]  ;;  %v137_v12 = vld [vmem:[%s711_s3 + $0x48] sm:$0xff]  ;;  %p487_p6 = scmp.lt.s32.totalorder %s324_s26, %s324_s26 }
  0x12   :  { %377 = vmatprep.subr.mxu0 %v509_v0  ;;  %388 = vmatprep.subr.mxu1 %v509_v0  ;;  %v140_v9 = vld [vmem:[%s711_s3 + $0x60] sm:$0xff]  ;;  %v135_v14 = vld [vmem:[%s711_s3 + $0x38] sm:$0xff]  ;;  %v134_v15 = vld [vmem:[%s711_s3 + $0x30] sm:$0xff] }
  0x13   :  { %378 = vmatpush3.msra.mxu0 %v44_v2  ;;  %389 = vmatpush3.msra.mxu1 %v142_v5  ;;  %v136_v13 = vld [vmem:[%s711_s3 + $0x40] sm:$0xff]  ;;  %v133_v16 = vld [vmem:[%s711_s3 + $0x28] sm:$0xff]  ;;  %v131_v18 = vld [vmem:[%s711_s3 + $0x18] sm:$0xff] }
  0x14   :  { %379 = vmatprep.subr.mxu0 %v509_v0  ;;  %390 = vmatprep.subr.mxu1 %v509_v0  ;;  %v132_v17 = vld [vmem:[%s711_s3 + $0x20] sm:$0xff]  ;;  %v130_v19 = vld [vmem:[%s711_s3 + $0x10] sm:$0xff]  ;;  %v129_v20 = vld [vmem:[%s711_s3 + $0x8] sm:$0xff] }
  0x15   :  { %380 = vmatpush3.msra.mxu0 %v43_v4  ;;  %391 = vmatpush3.msra.mxu1 %v141_v6  ;;  %v128_v21 = vld [vmem:[%s711_s3] sm:$0xff]  ;;  %v237_v22 = vld [vmem:[%s713_s5 + $0x78] sm:$0xff]  ;;  %v236_v23 = vld [vmem:[%s713_s5 + $0x70] sm:$0xff] }
  0x16   :  { %381 = vmatprep.subr.mxu0 %v509_v0  ;;  %392 = vmatprep.subr.mxu1 %v509_v0  ;;  %v235_v24 = vld [vmem:[%s713_s5 + $0x68] sm:$0xff]  ;;  %v234_v25 = vld [vmem:[%s713_s5 + $0x60] sm:$0xff]  ;;  %v233_v26 = vld [vmem:[%s713_s5 + $0x58] sm:$0xff] }
  0x17   :  { %382 = vmatpush3.msra.mxu0 %v42_v7  ;;  %393 = vmatpush3.msra.mxu1 %v140_v9  ;;  %v232_v27 = vld [vmem:[%s713_s5 + $0x50] sm:$0xff]  ;;  %v231_v28 = vld [vmem:[%s713_s5 + $0x48] sm:$0xff]  ;;  %v230_v29 = vld [vmem:[%s713_s5 + $0x40] sm:$0xff] }
  0x18   :  { %384 = vmatmul.mubr.msk.f32.vlgmr.msra.gmra.mxu0 %vm53_vm1, %v41_v8  ;;  %394 = vmatprep.subr.mxu1 %v509_v0  ;;  %v229_v30 = vld [vmem:[%s713_s5 + $0x38] sm:$0xff]  ;;  %v228_v31 = vld [vmem:[%s713_s5 + $0x30] sm:$0xff]  ;;  %v227_v32 = vld [vmem:[%s713_s5 + $0x28] sm:$0xff] }
  0x19   :  { %421 = vmatprep.subr.mxu0 %v509_v0  ;;  %395 = vmatpush3.msra.mxu1 %v139_v10  ;;  %v226_v33 = vld [vmem:[%s713_s5 + $0x20] sm:$0xff]  ;;  %v225_v34 = vld [vmem:[%s713_s5 + $0x18] sm:$0xff]  ;;  %v224_v40 = vld [vmem:[%s713_s5 + $0x10] sm:$0xff] }
  0x1a   :  { %453 = vmatprep.mubr.msk.f32.mxu0 %vm510_vm0, %v509_v0  ;;  %396 = vmatprep.subr.mxu1 %v509_v0  ;;  %v332_v35 = vld [vmem:[%s710_s2] ss:$0 sm:$0xff]  ;;  %v223_v41 = vld [vmem:[%s713_s5 + $0x8] sm:$0xff] }
  0x1b   :  { %397 = vmatpush3.msra.mxu1 %v138_v11  ;;  %422 = vmatpush3.msra.mxu0 %v237_v22  ;;  %v222_v42 = vld [vmem:[%s713_s5] sm:$0xff]  ;;  %s482_s5 = scalar_lea.vmem %s324_s26, 128 }
  0x1c   :  { %398 = vmatprep.subr.mxu1 %v509_v0  ;;  %423 = vmatprep.subr.mxu0 %v509_v0  ;;  %v334_v43 = vld [vmem:[%s712_s4] ss:$0 sm:$0xff]  ;;  %p483_p5 = scmp.ne.s32.totalorder %s324_s26, %s482_s5  ;;  %p488_p7 = scmp.lt.s32.totalorder %s482_s5, %s482_s5 }
  0x1d   :  { %399 = vmatpush3.msra.mxu1 %v137_v12  ;;  %424 = vmatpush3.msra.mxu0 %v236_v23  ;;  %v335_v48 = vld [vmem:[%s714_s6] ss:$0 sm:$0xff] }
  0x1e   :  { %400 = vmatprep.subr.mxu1 %v509_v0  ;;  %425 = vmatprep.subr.mxu0 %v509_v0  ;;  %p489_p8 = por %p488_p7, %p487_p6 }
  0x1f   :  { %401 = vmatpush3.msra.mxu1 %v136_v13  ;;  %426 = vmatpush3.msra.mxu0 %v235_v24 }
  0x20   :  { %402 = vmatprep.subr.mxu1 %v509_v0  ;;  %427 = vmatprep.subr.mxu0 %v509_v0  ;;  %p490_p9 = pnand %p489_p8, %p483_p5 }
  0x21   :  { %403 = vmatpush3.msra.mxu1 %v135_v14  ;;  %428 = vmatpush3.msra.mxu0 %v234_v25 }
  0x22   :  { %404 = vmatprep.subr.mxu1 %v509_v0  ;;  %429 = vmatprep.subr.mxu0 %v509_v0 }
  0x23   :  { %405 = vmatpush3.msra.mxu1 %v134_v15  ;;  %430 = vmatpush3.msra.mxu0 %v233_v26 }
  0x24   :  { %406 = vmatprep.subr.mxu1 %v509_v0  ;;  %431 = vmatprep.subr.mxu0 %v509_v0 }
  0x25   :  { %407 = vmatpush3.msra.mxu1 %v133_v16  ;;  %432 = vmatpush3.msra.mxu0 %v232_v27 }
  0x26   :  { %408 = vmatprep.subr.mxu1 %v509_v0  ;;  %433 = vmatprep.subr.mxu0 %v509_v0 }
  0x27   :  { %409 = vmatpush3.msra.mxu1 %v132_v17  ;;  %434 = vmatpush3.msra.mxu0 %v231_v28 }
  0x28   :  { %410 = vmatprep.subr.mxu1 %v509_v0  ;;  %435 = vmatprep.subr.mxu0 %v509_v0 }
  0x29   :  { %411 = vmatpush3.msra.mxu1 %v131_v18  ;;  %436 = vmatpush3.msra.mxu0 %v230_v29 }
  0x2a   :  { %412 = vmatprep.subr.mxu1 %v509_v0  ;;  %437 = vmatprep.subr.mxu0 %v509_v0 }
  0x2b   :  { %413 = vmatpush3.msra.mxu1 %v130_v19  ;;  %438 = vmatpush3.msra.mxu0 %v229_v30 }
  0x2c   :  { %414 = vmatprep.subr.mxu1 %v509_v0  ;;  %439 = vmatprep.subr.mxu0 %v509_v0 }
  0x2d   :  { %415 = vmatpush3.msra.mxu1 %v129_v20  ;;  %440 = vmatpush3.msra.mxu0 %v228_v31 }
  0x2e   :  { %416 = vmatprep.subr.mxu1 %v509_v0  ;;  %441 = vmatprep.subr.mxu0 %v509_v0 }
  0x2f   :  { %417 = vmatpush3.msra.mxu1 %v128_v21  ;;  %442 = vmatpush3.msra.mxu0 %v227_v32 }
  0x30   :  { %443 = vmatprep.subr.mxu0 %v509_v0 }
  0x31   :  { %444 = vmatpush3.msra.mxu0 %v226_v33 }
  0x32   :  { %445 = vmatprep.subr.mxu0 %v509_v0 }
  0x33   :  { %446 = vmatpush3.msra.mxu0 %v225_v34 }
  0x34   :  { %447 = vmatprep.subr.mxu0 %v509_v0 }
  0x35   :  { %448 = vmatpush3.msra.mxu0 %v224_v40 }
  0x36   :  { %449 = vmatprep.subr.mxu0 %v509_v0 }
  0x37   :  { %450 = vmatpush3.msra.mxu0 %v223_v41 }
  0x38   :  { %451 = vmatprep.subr.mxu0 %v509_v0 }
  0x39   :  { %452 = vmatpush3.msra.mxu0 %v222_v42 }
  0xd8   :  { %v123_v36 = vpop.f32.mrf.mxu0 }
  0xd9   :  { %v124_v37 = vadd.f32 %v332_v35, %v123_v36 }
  0xda   :  { %v385_v38 = vpop.f32.mrf.mxu0 }
  0xdb   :  { %v127_v39 = vmax.f32 %v124_v37, 0.0 }
  0xdd   :  { %419 = vmatmul.mubr.f32.vlgmr.msra.gmra.mxu1 %v127_v39 }
 0x19d   :  { %v217_v44 = vpop.f32.mrf.mxu1 }
 0x19e   :  { %v218_v45 = vadd.f32 %v334_v43, %v217_v44 }
 0x19f   :  { %v420_v46 = vpop.f32.mrf.mxu1 }
 0x1a0   :  { %v221_v47 = vmax.f32 %v218_v45, 0.0 }
 0x1a2   :  { %454 = vmatmul.mubr.f32.vlgmr.msra.gmra.mxu0 %v221_v47 }
 0x262   :  { %v311_v49 = vpop.f32.mrf.mxu0 }
 0x263   :  { %v312_v50 = vadd.f32 %v335_v48, %v311_v49 }
 0x264   :  { %v455_v51 = vpop.f32.mrf.mxu0 }
 0x265   :  { %316 = vst.msk [vmem:[#allocation5] sm:$0xff] %vm315_vm2, %v312_v50 }
 0x266   :  { %493 = shalt.err (!%p490_p9)
}
 0x267   :  { %326 = dma.vmem_to_hbm [thread:$0]  %s324_s26, 128, %s715_s7, [#allocation4]  }
 0x268   :  { %504 = dma.done.wait [#allocation4], 128  }
 0x269   :  { %505 = vsyncadd [#allocation4], 4294967168 }
 0x26a   :  { %330 = vsyncpa [#allocation3], 1 }
 0x26b   :  { %331 = vsyncpa [#allocation4], 1 }

// kernel: tpu_custom_call.1
= control target key start
LH: loop header
LB: loop body
LE: loop exit
PB: predicated region body
PF: predicated region fallthrough
CT: control target
= control target key end

     0   :  { %12 = vsyncpa [#allocation3], 0  ;;  %s708_s0 = inlined_call_operand.vmem [shape: f32[8,32], index: 0, kind: input, shape index: {}]   ;;  %s709_s1 = inlined_call_operand.hbm [shape: f32[32,128], index: 1, kind: input, shape index: {}]   ;;  %s710_s2 = inlined_call_operand.vmem [shape: f32[1,128], index: 2, kind: input, shape index: {}]   ;;  %s711_s3 = inlined_call_operand.vmem [shape: f32[128,128], index: 3, kind: input, shape index: {}]   ;;  %s712_s4 = inlined_call_operand.vmem [shape: f32[1,128], index: 4, kind: input, shape index: {}]   ;;  %s713_s5 = inlined_call_operand.vmem [shape: f32[128,10], index: 5, kind: input, shape index: {}]   ;;  %s714_s6 = inlined_call_operand.vmem [shape: f32[1,10], index: 6, kind: input, shape index: {}]   ;;  %s715_s7 = inlined_call_operand.hbm [shape: f32[8,10], index: 7, kind: output, shape index: {}]  }
   0x1   :  { %13 = vsyncpa [#allocation4], 0  ;;  %s506_s24 = smov [#allocation2]  }
   0x2   :  { %s21_s25 = sshll.u32 %s506_s24, 4  ;;  %s22_s25 = int_to_ptr.vmem [resolvable:$true] %s21_s25 }
   0x3   :  { %s470_s26 = scalar_lea.vmem %s22_s25, 512  ;;  %p475_p1 = scmp.lt.s32.totalorder %s22_s25, %s22_s25 }
   0x4   :  { %p471_p0 = scmp.ne.s32.totalorder %s22_s25, %s470_s26  ;;  %p476_p2 = scmp.lt.s32.totalorder %s470_s26, %s470_s26 }
   0x6   :  { %p477_p3 = por %p476_p2, %p475_p1 }
   0x8   :  { %p478_p4 = pnand %p477_p3, %p471_p0 }
   0xa   :  { %481 = shalt.err (!%p478_p4)
}
   0xb   :  { %s507_s27 = smov 128   ;;  %s508_s28 = smov 8  }
   0xc   :  { %27 = dma.hbm_to_vmem [thread:$0]  %s709_s1, 512, %s22_s25, [#allocation3], %s507_s27, %s507_s27, %s508_s28  }
   0xd   :  { %502 = dma.done.wait [#allocation3], 512  }
   0xe   :  { %503 = vsyncadd [#allocation3], 4294966784  ;;  %v509_v0 = vmov 0.0   ;;  %vm510_vm0 = vmmov 0   ;;  %v45_v1 = vld [vmem:[#allocation2 + $0x18] sm:$0xff]  ;;  %v44_v2 = vld [vmem:[#allocation2 + $0x10] sm:$0xff] }
   0xf   :  { %375 = vmatprep.subr.mxu0 %v509_v0  ;;  %383 = vmatprep.mubr.msk.f32.mxu0 %vm510_vm0, %v509_v0  ;;  %v143_v3 = vld [vmem:[%s711_s3 + $0x78] sm:$0xff]  ;;  %v43_v4 = vld [vmem:[#allocation2 + $0x8] sm:$0xff]  ;;  %v142_v5 = vld [vmem:[%s711_s3 + $0x70] sm:$0xff]  ;;  %vm53_vm1 = vcmask 261120   ;;  %s511_s25 = smov [#allocation5]   ;;  %vm315_vm2 = vcmask 80896  }
  0x10   :  { %386 = vmatprep.subr.mxu1 %v509_v0  ;;  %418 = vmatprep.mubr.msk.f32.mxu1 %vm510_vm0, %v509_v0  ;;  %v141_v6 = vld [vmem:[%s711_s3 + $0x68] sm:$0xff]  ;;  %v42_v7 = vld [vmem:[#allocation2] sm:$0xff]  ;;  %v139_v10 = vld [vmem:[%s711_s3 + $0x58] sm:$0xff]  ;;  %s323_s26 = sshll.u32 %s511_s25, 4  ;;  %s324_s26 = int_to_ptr.vmem [resolvable:$true] %s323_s26 }
  0x11   :  { %376 = vmatpush3.msra.mxu0 %v45_v1  ;;  %387 = vmatpush3.msra.mxu1 %v143_v3  ;;  %v41_v8 = vld [vmem:[%s708_s0] sm:$0xff]  ;;  %v138_v11 = vld [vmem:[%s711_s3 + $0x50] sm:$0xff]  ;;  %v137_v12 = vld [vmem:[%s711_s3 + $0x48] sm:$0xff]  ;;  %p487_p6 = scmp.lt.s32.totalorder %s324_s26, %s324_s26 }
  0x12   :  { %377 = vmatprep.subr.mxu0 %v509_v0  ;;  %388 = vmatprep.subr.mxu1 %v509_v0  ;;  %v140_v9 = vld [vmem:[%s711_s3 + $0x60] sm:$0xff]  ;;  %v135_v14 = vld [vmem:[%s711_s3 + $0x38] sm:$0xff]  ;;  %v134_v15 = vld [vmem:[%s711_s3 + $0x30] sm:$0xff] }
  0x13   :  { %378 = vmatpush3.msra.mxu0 %v44_v2  ;;  %389 = vmatpush3.msra.mxu1 %v142_v5  ;;  %v136_v13 = vld [vmem:[%s711_s3 + $0x40] sm:$0xff]  ;;  %v133_v16 = vld [vmem:[%s711_s3 + $0x28] sm:$0xff]  ;;  %v131_v18 = vld [vmem:[%s711_s3 + $0x18] sm:$0xff] }
  0x14   :  { %379 = vmatprep.subr.mxu0 %v509_v0  ;;  %390 = vmatprep.subr.mxu1 %v509_v0  ;;  %v132_v17 = vld [vmem:[%s711_s3 + $0x20] sm:$0xff]  ;;  %v130_v19 = vld [vmem:[%s711_s3 + $0x10] sm:$0xff]  ;;  %v129_v20 = vld [vmem:[%s711_s3 + $0x8] sm:$0xff] }
  0x15   :  { %380 = vmatpush3.msra.mxu0 %v43_v4  ;;  %391 = vmatpush3.msra.mxu1 %v141_v6  ;;  %v128_v21 = vld [vmem:[%s711_s3] sm:$0xff]  ;;  %v237_v22 = vld [vmem:[%s713_s5 + $0x78] sm:$0xff]  ;;  %v236_v23 = vld [vmem:[%s713_s5 + $0x70] sm:$0xff] }
  0x16   :  { %381 = vmatprep.subr.mxu0 %v509_v0  ;;  %392 = vmatprep.subr.mxu1 %v509_v0  ;;  %v235_v24 = vld [vmem:[%s713_s5 + $0x68] sm:$0xff]  ;;  %v234_v25 = vld [vmem:[%s713_s5 + $0x60] sm:$0xff]  ;;  %v233_v26 = vld [vmem:[%s713_s5 + $0x58] sm:$0xff] }
  0x17   :  { %382 = vmatpush3.msra.mxu0 %v42_v7  ;;  %393 = vmatpush3.msra.mxu1 %v140_v9  ;;  %v232_v27 = vld [vmem:[%s713_s5 + $0x50] sm:$0xff]  ;;  %v231_v28 = vld [vmem:[%s713_s5 + $0x48] sm:$0xff]  ;;  %v230_v29 = vld [vmem:[%s713_s5 + $0x40] sm:$0xff] }
  0x18   :  { %384 = vmatmul.mubr.msk.f32.vlgmr.msra.gmra.mxu0 %vm53_vm1, %v41_v8  ;;  %394 = vmatprep.subr.mxu1 %v509_v0  ;;  %v229_v30 = vld [vmem:[%s713_s5 + $0x38] sm:$0xff]  ;;  %v228_v31 = vld [vmem:[%s713_s5 + $0x30] sm:$0xff]  ;;  %v227_v32 = vld [vmem:[%s713_s5 + $0x28] sm:$0xff] }
  0x19   :  { %421 = vmatprep.subr.mxu0 %v509_v0  ;;  %395 = vmatpush3.msra.mxu1 %v139_v10  ;;  %v226_v33 = vld [vmem:[%s713_s5 + $0x20] sm:$0xff]  ;;  %v225_v34 = vld [vmem:[%s713_s5 + $0x18] sm:$0xff]  ;;  %v224_v40 = vld [vmem:[%s713_s5 + $0x10] sm:$0xff] }
  0x1a   :  { %453 = vmatprep.mubr.msk.f32.mxu0 %vm510_vm0, %v509_v0  ;;  %396 = vmatprep.subr.mxu1 %v509_v0  ;;  %v332_v35 = vld [vmem:[%s710_s2] ss:$0 sm:$0xff]  ;;  %v223_v41 = vld [vmem:[%s713_s5 + $0x8] sm:$0xff] }
  0x1b   :  { %397 = vmatpush3.msra.mxu1 %v138_v11  ;;  %422 = vmatpush3.msra.mxu0 %v237_v22  ;;  %v222_v42 = vld [vmem:[%s713_s5] sm:$0xff]  ;;  %s482_s5 = scalar_lea.vmem %s324_s26, 128 }
  0x1c   :  { %398 = vmatprep.subr.mxu1 %v509_v0  ;;  %423 = vmatprep.subr.mxu0 %v509_v0  ;;  %v334_v43 = vld [vmem:[%s712_s4] ss:$0 sm:$0xff]  ;;  %p483_p5 = scmp.ne.s32.totalorder %s324_s26, %s482_s5  ;;  %p488_p7 = scmp.lt.s32.totalorder %s482_s5, %s482_s5 }
  0x1d   :  { %399 = vmatpush3.msra.mxu1 %v137_v12  ;;  %424 = vmatpush3.msra.mxu0 %v236_v23  ;;  %v335_v48 = vld [vmem:[%s714_s6] ss:$0 sm:$0xff] }
  0x1e   :  { %400 = vmatprep.subr.mxu1 %v509_v0  ;;  %425 = vmatprep.subr.mxu0 %v509_v0  ;;  %p489_p8 = por %p488_p7, %p487_p6 }
  0x1f   :  { %401 = vmatpush3.msra.mxu1 %v136_v13  ;;  %426 = vmatpush3.msra.mxu0 %v235_v24 }
  0x20   :  { %402 = vmatprep.subr.mxu1 %v509_v0  ;;  %427 = vmatprep.subr.mxu0 %v509_v0  ;;  %p490_p9 = pnand %p489_p8, %p483_p5 }
  0x21   :  { %403 = vmatpush3.msra.mxu1 %v135_v14  ;;  %428 = vmatpush3.msra.mxu0 %v234_v25 }
  0x22   :  { %404 = vmatprep.subr.mxu1 %v509_v0  ;;  %429 = vmatprep.subr.mxu0 %v509_v0 }
  0x23   :  { %405 = vmatpush3.msra.mxu1 %v134_v15  ;;  %430 = vmatpush3.msra.mxu0 %v233_v26 }
  0x24   :  { %406 = vmatprep.subr.mxu1 %v509_v0  ;;  %431 = vmatprep.subr.mxu0 %v509_v0 }
  0x25   :  { %407 = vmatpush3.msra.mxu1 %v133_v16  ;;  %432 = vmatpush3.msra.mxu0 %v232_v27 }
  0x26   :  { %408 = vmatprep.subr.mxu1 %v509_v0  ;;  %433 = vmatprep.subr.mxu0 %v509_v0 }
  0x27   :  { %409 = vmatpush3.msra.mxu1 %v132_v17  ;;  %434 = vmatpush3.msra.mxu0 %v231_v28 }
  0x28   :  { %410 = vmatprep.subr.mxu1 %v509_v0  ;;  %435 = vmatprep.subr.mxu0 %v509_v0 }
  0x29   :  { %411 = vmatpush3.msra.mxu1 %v131_v18  ;;  %436 = vmatpush3.msra.mxu0 %v230_v29 }
  0x2a   :  { %412 = vmatprep.subr.mxu1 %v509_v0  ;;  %437 = vmatprep.subr.mxu0 %v509_v0 }
  0x2b   :  { %413 = vmatpush3.msra.mxu1 %v130_v19  ;;  %438 = vmatpush3.msra.mxu0 %v229_v30 }
  0x2c   :  { %414 = vmatprep.subr.mxu1 %v509_v0  ;;  %439 = vmatprep.subr.mxu0 %v509_v0 }
  0x2d   :  { %415 = vmatpush3.msra.mxu1 %v129_v20  ;;  %440 = vmatpush3.msra.mxu0 %v228_v31 }
  0x2e   :  { %416 = vmatprep.subr.mxu1 %v509_v0  ;;  %441 = vmatprep.subr.mxu0 %v509_v0 }
  0x2f   :  { %417 = vmatpush3.msra.mxu1 %v128_v21  ;;  %442 = vmatpush3.msra.mxu0 %v227_v32 }
  0x30   :  { %443 = vmatprep.subr.mxu0 %v509_v0 }
  0x31   :  { %444 = vmatpush3.msra.mxu0 %v226_v33 }
  0x32   :  { %445 = vmatprep.subr.mxu0 %v509_v0 }
  0x33   :  { %446 = vmatpush3.msra.mxu0 %v225_v34 }
  0x34   :  { %447 = vmatprep.subr.mxu0 %v509_v0 }
  0x35   :  { %448 = vmatpush3.msra.mxu0 %v224_v40 }
  0x36   :  { %449 = vmatprep.subr.mxu0 %v509_v0 }
  0x37   :  { %450 = vmatpush3.msra.mxu0 %v223_v41 }
  0x38   :  { %451 = vmatprep.subr.mxu0 %v509_v0 }
  0x39   :  { %452 = vmatpush3.msra.mxu0 %v222_v42 }
  0xd8   :  { %v123_v36 = vpop.f32.mrf.mxu0 }
  0xd9   :  { %v124_v37 = vadd.f32 %v332_v35, %v123_v36 }
  0xda   :  { %v385_v38 = vpop.f32.mrf.mxu0 }
  0xdb   :  { %v127_v39 = vmax.f32 %v124_v37, 0.0 }
  0xdd   :  { %419 = vmatmul.mubr.f32.vlgmr.msra.gmra.mxu1 %v127_v39 }
 0x19d   :  { %v217_v44 = vpop.f32.mrf.mxu1 }
 0x19e   :  { %v218_v45 = vadd.f32 %v334_v43, %v217_v44 }
 0x19f   :  { %v420_v46 = vpop.f32.mrf.mxu1 }
 0x1a0   :  { %v221_v47 = vmax.f32 %v218_v45, 0.0 }
 0x1a2   :  { %454 = vmatmul.mubr.f32.vlgmr.msra.gmra.mxu0 %v221_v47 }
 0x262   :  { %v311_v49 = vpop.f32.mrf.mxu0 }
 0x263   :  { %v312_v50 = vadd.f32 %v335_v48, %v311_v49 }
 0x264   :  { %v455_v51 = vpop.f32.mrf.mxu0 }
 0x265   :  { %316 = vst.msk [vmem:[#allocation5] sm:$0xff] %vm315_vm2, %v312_v50 }
 0x266   :  { %493 = shalt.err (!%p490_p9)
}
 0x267   :  { %326 = dma.vmem_to_hbm [thread:$0]  %s324_s26, 128, %s715_s7, [#allocation4]  }
 0x268   :  { %504 = dma.done.wait [#allocation4], 128  }
 0x269   :  { %505 = vsyncadd [#allocation4], 4294967168 }
 0x26a   :  { %330 = vsyncpa [#allocation3], 1 }
 0x26b   :  { %331 = vsyncpa [#allocation4], 1 }

</bundles_post_ra>
